<compile_context>
chip_gen: v6e
topology: v6e:2x2x1
jax: 0.10.0
libtpu: 0.0.40
codegen_flags: <defaults>
</compile_context>

<pallas_src>
import functools

import jax
import jax.numpy as jnp
from jax.experimental import pallas as pl
from jax.experimental.pallas import tpu as pltpu


def _round_up(a, b):
    return (a + b - 1) // b * b


def fg_kernel(x_ref, w_ref, b_ref, o_ref):
    """x_ref: [bm, K] f32; w_ref: [K, 2*tn] bf16 (= [W1 tile | W2 tile]);
    b_ref: [1, 2*tn] f32; o_ref: [bm, tn] f32."""
    tn = o_ref.shape[-1]
    x = x_ref[...].astype(jnp.bfloat16)
    # One fused, wide matmul on the MXU with f32 accumulation.
    h = jnp.dot(x, w_ref[...], preferred_element_type=jnp.float32) + b_ref[...]
    h1 = h[:, :tn]                                           # info pre-activation
    h2 = h[:, tn:]                                           # gate pre-activation
    info = jnp.maximum(h1, 0.0)                              # ReLU
    gate = pl.reciprocal(1.0 + jnp.exp(-h2), approx=True)    # Sigmoid (EUP exp + rcp)
    # info >= 0 and gate in (0,1) => the module's trailing ReLU is a no-op; skip it.
    o_ref[...] = (info * gate).astype(o_ref.dtype)


def _pick_tile_n(out_size, tile_n):
    if out_size % 128 != 0 or out_size <= 128:
        return out_size                      # full-extent block (legal for any size)
    tile_n = max(128, (min(tile_n, out_size) // 128) * 128)
    while out_size % tile_n:
        tile_n -= 128
    return tile_n


@functools.partial(jax.jit, static_argnames=("block_m", "tile_n"))
def fg_layer(x, w1_t, b1, w2_t, b2, *, block_m=256, tile_n=256):
    """x: [B, in_size]; w*_t: [in_size, out_size]; b*: [1, out_size]."""
    B, in_size = x.shape
    out_size = w1_t.shape[1]

    tile_n = _pick_tile_n(out_size, tile_n)
    n_tiles = out_size // tile_n

    block_m = max(8, min(_round_up(block_m, 8), _round_up(B, 8)))
    B_pad = _round_up(B, block_m)
    if B_pad != B:
        x = jnp.pad(x, ((0, B_pad - B), (0, 0)))

    # Fuse W1^T / W2^T per output tile: [in, n_tiles, 2, tile_n] -> [in, 2*out].
    # Fused block j along the last dim is [W1 tile j | W2 tile j].
    w_fused = jnp.stack(
        [w1_t.reshape(in_size, n_tiles, tile_n),
         w2_t.reshape(in_size, n_tiles, tile_n)],
        axis=2,
    ).reshape(in_size, 2 * out_size).astype(jnp.bfloat16)
    b_fused = jnp.stack(
        [b1.reshape(1, n_tiles, tile_n), b2.reshape(1, n_tiles, tile_n)],
        axis=2,
    ).reshape(1, 2 * out_size).astype(jnp.float32)

    # Weights on the outer axis -> each weight tile is DMA'd once and reused
    # across all batch tiles.  Both axes are independent -> "parallel".
    grid = (n_tiles, B_pad // block_m)

    cost = pl.CostEstimate(
        flops=2 * B_pad * in_size * 2 * out_size + 4 * B_pad * out_size,
        transcendentals=2 * B_pad * out_size,
        bytes_accessed=(x.size * 4 + w_fused.size * 2 + b_fused.size * 4
                        + B_pad * out_size * 4),
    )

    out = pl.pallas_call(
        fg_kernel,
        out_shape=jax.ShapeDtypeStruct((B_pad, out_size), x.dtype),
        grid_spec=pltpu.PrefetchScalarGridSpec(
            num_scalar_prefetch=0,
            grid=grid,
            in_specs=[
                pl.BlockSpec((block_m, in_size), lambda j, i: (i, 0)),     # x tile
                pl.BlockSpec((in_size, 2 * tile_n), lambda j, i: (0, j)),  # [W1|W2] tile
                pl.BlockSpec((1, 2 * tile_n), lambda j, i: (0, j)),        # [b1|b2] tile
            ],
            out_specs=pl.BlockSpec((block_m, tile_n), lambda j, i: (i, j)),
        ),
        compiler_params=pltpu.CompilerParams(
            dimension_semantics=("parallel", "parallel"),
            vmem_limit_bytes=48 << 20,  # safely under v7x's 64 MiB, >> scoped default
        ),
        cost_estimate=cost,
    )(x, w_fused, b_fused)

    return out[:B] if B_pad != B else out


def init_fg_params(key, in_size, out_size, dtype=jnp.float32):
    """Deterministic init mimicking torch.nn.Linear's U(-1/sqrt(in), 1/sqrt(in))."""
    k1, k2, k3, k4 = jax.random.split(key, 4)
    bound = 1.0 / jnp.sqrt(jnp.asarray(in_size, dtype))
    # PyTorch stores Linear weight as [out, in]; we transpose to [in, out].
    w1 = jax.random.uniform(k1, (out_size, in_size), dtype, -bound, bound)
    b1 = jax.random.uniform(k2, (out_size,), dtype, -bound, bound)
    w2 = jax.random.uniform(k3, (out_size, in_size), dtype, -bound, bound)
    b2 = jax.random.uniform(k4, (out_size,), dtype, -bound, bound)
    return w1.T, b1.reshape(1, -1), w2.T, b2.reshape(1, -1)


def fg_layer_ref(x, w1_t, b1, w2_t, b2):
    """Pure-JAX reference matching the kernel's bf16-matmul / f32-accumulate math."""
    xb = x.astype(jnp.bfloat16)
    h1 = jnp.dot(xb, w1_t.astype(jnp.bfloat16), preferred_element_type=jnp.float32) + b1
    h2 = jnp.dot(xb, w2_t.astype(jnp.bfloat16), preferred_element_type=jnp.float32) + b2
    info = jnp.maximum(h1, 0.0)
    gate = jax.nn.sigmoid(h2)
    return jnp.maximum(info * gate, 0.0)


if __name__ == "__main__":
    key = jax.random.PRNGKey(0)
    k_x, k_p = jax.random.split(key)

    # Modest shapes, but large enough to give >=2 grid steps per axis (2x2 grid).
    batch, in_size, out_size = 512, 128, 256
    x = jax.random.normal(k_x, (batch, in_size), dtype=jnp.float32)
    w1_t, b1, w2_t, b2 = init_fg_params(k_p, in_size, out_size)

    out = fg_layer(x, w1_t, b1, w2_t, b2, block_m=256, tile_n=128)
    out = jax.block_until_ready(out)

    ref = fg_layer_ref(x, w1_t, b1, w2_t, b2)
    assert out.shape == (batch, out_size)
    max_err = float(jnp.max(jnp.abs(out - ref)))
    assert jnp.allclose(out, ref, atol=1e-2, rtol=1e-2), f"max_err={max_err}"

    print("KERNEL_OK")
</pallas_src>

<mosaic_0001>
module attributes {stable_mosaic.version = 11 : i64} {
  func.func @fg_kernel(%arg0: i32, %arg1: i32, %arg2: memref<256x128xf32, #tpu.memory_space<vmem>>, %arg3: memref<128x256xbf16, #tpu.memory_space<vmem>>, %arg4: memref<1x256xf32, #tpu.memory_space<vmem>>, %arg5: memref<256x128xf32, #tpu.memory_space<vmem>>) attributes {dimension_semantics = [#tpu.dimension_semantics<parallel>, #tpu.dimension_semantics<parallel>], iteration_bounds = array<i64: 2, 2>, scalar_prefetch = 0 : i64, scratch_operands = 0 : i64, tpu.core_type = #tpu.core_type<tc>, window_params = [{transform_indices = @transform_0, window_bounds = array<i64: 256, 128>}, {transform_indices = @transform_1, window_bounds = array<i64: 128, 256>}, {transform_indices = @transform_2, window_bounds = array<i64: 1, 256>}, {transform_indices = @transform_3, window_bounds = array<i64: 256, 128>}]} {
    %c0 = arith.constant 0 : index
    %c0_0 = arith.constant 0 : index
    %0 = vector.load %arg2[%c0, %c0_0] : memref<256x128xf32, #tpu.memory_space<vmem>>, vector<256x128xf32>
    %1 = arith.truncf %0 : vector<256x128xf32> to vector<256x128xbf16>
    %c0_1 = arith.constant 0 : index
    %c0_2 = arith.constant 0 : index
    %2 = vector.load %arg3[%c0_1, %c0_2] : memref<128x256xbf16, #tpu.memory_space<vmem>>, vector<128x256xbf16>
    %cst = arith.constant dense<0.000000e+00> : vector<256x256xf32>
    %3 = tpu.matmul %1, %2, %cst {dimension_numbers = #tpu.dot_dimension_numbers<[1], [0], [0], [1], [0, 0, 1, 1], [], []>} : vector<256x128xbf16>, vector<128x256xbf16>, vector<256x256xf32> -> vector<256x256xf32>
    %c0_3 = arith.constant 0 : index
    %c0_4 = arith.constant 0 : index
    %4 = vector.load %arg4[%c0_3, %c0_4] : memref<1x256xf32, #tpu.memory_space<vmem>>, vector<1x256xf32>
    %5 = vector.broadcast %4 : vector<1x256xf32> to vector<256x256xf32>
    %6 = arith.addf %3, %5 : vector<256x256xf32>
    %7 = vector.extract_strided_slice %6 {offsets = [0, 0], sizes = [256, 128], strides = [1, 1]} : vector<256x256xf32> to vector<256x128xf32>
    %8 = vector.extract_strided_slice %6 {offsets = [0, 128], sizes = [256, 128], strides = [1, 1]} : vector<256x256xf32> to vector<256x128xf32>
    %cst_5 = arith.constant 0.000000e+00 : f32
    %9 = vector.broadcast %cst_5 : f32 to vector<256x128xf32>
    %10 = arith.maximumf %7, %9 : vector<256x128xf32>
    %cst_6 = arith.constant 0.000000e+00 : f32
    %11 = vector.broadcast %cst_6 : f32 to vector<256x128xf32>
    %12 = arith.subf %11, %8 : vector<256x128xf32>
    %13 = math.exp %12 : vector<256x128xf32>
    %cst_7 = arith.constant 1.000000e+00 : f32
    %14 = vector.broadcast %cst_7 : f32 to vector<256x128xf32>
    %15 = arith.addf %14, %13 : vector<256x128xf32>
    %16 = tpu.reciprocal %15 {approx = true} : vector<256x128xf32> -> vector<256x128xf32>
    %17 = arith.mulf %10, %16 : vector<256x128xf32>
    %c0_8 = arith.constant 0 : index
    %c0_9 = arith.constant 0 : index
    %18 = vector.load %arg5[%c0_8, %c0_9] : memref<256x128xf32, #tpu.memory_space<vmem>>, vector<256x128xf32>
    tpu.vector_store %arg5[%c0_8, %c0_9], %17 {strides = array<i32>} : memref<256x128xf32, #tpu.memory_space<vmem>>, vector<256x128xf32>,
    return
  }
  func.func @transform_0(%arg0: i32, %arg1: i32) -> (i32, i32) {
    %c0_i32 = arith.constant 0 : i32
    %c0_i32_0 = arith.constant 0 : i32
    return %arg1, %c0_i32 : i32, i32
  }
  func.func @transform_1(%arg0: i32, %arg1: i32) -> (i32, i32) {
    %c0_i32 = arith.constant 0 : i32
    %c0_i32_0 = arith.constant 0 : i32
    return %c0_i32, %arg0 : i32, i32
  }
  func.func @transform_2(%arg0: i32, %arg1: i32) -> (i32, i32) {
    %c0_i32 = arith.constant 0 : i32
    %c0_i32_0 = arith.constant 0 : i32
    return %c0_i32, %arg0 : i32, i32
  }
  func.func @transform_3(%arg0: i32, %arg1: i32) -> (i32, i32) {
    %c0_i32 = arith.constant 0 : i32
    return %arg1, %arg0 : i32, i32
  }
}

</mosaic_0001>

<bundles_post_ra>
// kernel: fg_layer.1
= control target key start
LH: loop header
LB: loop body
LE: loop exit
PB: predicated region body
PF: predicated region fallthrough
CT: control target
= control target key end

     0   :  { %8 = vsyncpa [#allocation4], 0  ;;  %s1974_s0 = inlined_call_operand.vmem [shape: f32[512,128], index: 0, kind: input, shape index: {}]   ;;  %s1975_s1 = inlined_call_operand.vmem [shape: bf16[128,512], index: 1, kind: input, shape index: {}]   ;;  %s1976_s2 = inlined_call_operand.vmem [shape: f32[1,512], index: 2, kind: input, shape index: {}]   ;;  %s1977_s3 = inlined_call_operand.hbm [shape: f32[512,256], index: 3, kind: output, shape index: {}]  }
   0x1   :  { %10 = vsyncpa [#allocation4 + $0x1], 0  ;;  %s1477_s12 = smov 0   ;;  %s1479_s13 = smov 0  }
   0x2   :  { %s1481_s14 = smov 0   ;;  %s1483_s15 = smov 0  }
   0x3   :  { %s1485_s16 = smov 0   ;;  %s1487_s17 = smov 0  }
   0x4   :  { %s1489_s18 = smov 0   ;;  %s1491_s19 = smov 0  }
   0x5   :  { %s1493_s20 = smov 0   ;;  %s1495_s21 = smov 0  }
   0x6 LB: > { %s1046_s22 = sadd.s32 4294967295, %s1450_s21   ;;  %s1047_s23 = sadd.s32 4294967294, %s1450_s21   ;;  %s1450_s21 = sphi %s1495_s21, %s16_s21   ;;  %s1446_s20 = sphi %s1493_s20, %s1989_s20   ;;  %s1442_s19 = sphi %s1491_s19, %s1988_s19   ;;  %s1438_s18 = sphi %s1489_s18, %s1987_s18   ;;  %s1434_s17 = sphi %s1487_s17, %s1986_s17   ;;  %s1430_s16 = sphi %s1485_s16, %s1985_s16   ;;  %s1426_s15 = sphi %s1483_s15, %s1984_s15   ;;  %s1422_s14 = sphi %s1481_s14, %s1983_s14   ;;  %s1418_s13 = sphi %s1479_s13, %s1982_s13   ;;  %s1414_s12 = sphi %s1477_s12, %s1981_s12  }
   0x7   : > { %s25_s24 = sadd.s32 1, %s1442_s19  ;;  %s28_s25 = sadd.s32 1, %s1446_s20 }
   0x8   : > { %p26_p0 = scmp.ge.s32.totalorder %s25_s24, 2  ;;  %s61_s26 = sadd.s32 1, %s1430_s16 }
   0x9   : > { %p68_p1 = scmp.ne.s32.totalorder %s1430_s16, %s1426_s15  ;;  %p69_p2 = scmp.eq.s32.totalorder %s1450_s21, 0 }
   0xa   : > { %s1991_s24 = smov (%p26_p0, %s25_s24), 0  ;;  %s1993_s25 = smov (!%p26_p0, %s28_s25), %s1446_s20 }
   0xb   : > { %p1538_p3 = por %p69_p2, %p68_p1  ;;  %s110_s28 = ssub.s32 %s1442_s19, %s1991_s24 }
   0xc   : > { %p30_p4 = scmp.ge.s32.totalorder %s1993_s25, 2  ;;  %s115_s29 = sadd.s32 1, %s1422_s14 }
   0xd   : > { %p125_p5 = scmp.ne.s32.totalorder %s1422_s14, %s1418_s13  ;;  %p126_p6 = scmp.eq.s32.totalorder %s1046_s22, 3 }
   0xe   : > { %s1995_s25 = smov (%p30_p4, %s1993_s25), 0  ;;  %p131_p8 = scmp.ne.s32.totalorder %s1418_s13, %s1414_s12 }
   0xf   : > { %p1549_p7 = por %p126_p6, %p125_p5  ;;  %s58_s4 = ssub.s32 %s1446_s20, %s1995_s25 }
  0x10   : > { %p132_p9 = scmp.eq.s32.totalorder %s1047_s23, 3  ;;  %p59_p10 = scmp.eq.s32.totalorder %s58_s4, 0 }
  0x11   : > { %s112_s5 = sor.u32 %s110_s28, %s58_s4  ;;  %p1049_p13 = scmp.ge.s32.totalorder %s1450_s21, 4 }
  0x12   : > { %p113_p11 = scmp.eq.s32.totalorder %s112_s5, 0  ;;  %p1557_p12 = por %p132_p9, %p131_p8 }
  0x13   : > { %s1562_s7 = scalar_select %p59_p10, %s1430_s16, %s61_s26  }
  0x14   : > { %s1565_s8 = scalar_select %p113_p11, %s1422_s14, %s115_s29  }
  0x15   : > { %148 = sbr.rel (%p1049_p13) target bundleno = 38 (0x26), region = 16 }
  0x1a   : > { %160 = sbr.rel (!%p1538_p3) target bundleno = 38 (0x26), region = 24  ;;  %s162_s9 = sand.u32 (%p1538_p3), 1, %s1430_s16  }
  0x1b   : > { %s1081_s10 = sshll.u32 (%p1538_p3), %s1446_s20, 3  ;;  %s1050_s11 = sshll.u32 (%p1538_p3), %s162_s9, 7 }
  0x1c   : > { %s1575_s28 = scalar_lea.vmem (%p1538_p3), %s1975_s1, %s1081_s10  ;;  %s164_s26 = scalar_lea.vmem (%p1538_p3), [#allocation2], %s1050_s11 }
  0x1d   : > { %v226_v0 = vld [vmem:[%s1575_s28] sm:$0xff] (%p1538_p3)  ;;  %v228_v1 = vld [vmem:[%s1575_s28 + $0x10] sm:$0xff] (%p1538_p3) }
  0x1e   : > { %v230_v2 = vld [vmem:[%s1575_s28 + $0x20] sm:$0xff] (%p1538_p3)  ;;  %227 = vst [vmem:[%s164_s26] sm:$0xff] (%p1538_p3), %v226_v0  ;;  %229 = vst [vmem:[%s164_s26 + $0x8] sm:$0xff] (%p1538_p3), %v228_v1  ;;  %v232_v3 = vld [vmem:[%s1575_s28 + $0x30] sm:$0xff] (%p1538_p3) }
  0x1f   : > { %231 = vst [vmem:[%s164_s26 + $0x10] sm:$0xff] %v230_v2  ;;  %v234_v4 = vld [vmem:[%s1575_s28 + $0x40] sm:$0xff]  ;;  %v236_v5 = vld [vmem:[%s1575_s28 + $0x50] sm:$0xff]  ;;  %233 = vst [vmem:[%s164_s26 + $0x18] sm:$0xff] %v232_v3 }
  0x20   : > { %235 = vst [vmem:[%s164_s26 + $0x20] sm:$0xff] %v234_v4  ;;  %237 = vst [vmem:[%s164_s26 + $0x28] sm:$0xff] %v236_v5  ;;  %v238_v6 = vld [vmem:[%s1575_s28 + $0x60] sm:$0xff]  ;;  %v240_v7 = vld [vmem:[%s1575_s28 + $0x70] sm:$0xff] }
  0x21   : > { %v242_v8 = vld [vmem:[%s1575_s28 + $0x80] sm:$0xff]  ;;  %239 = vst [vmem:[%s164_s26 + $0x30] sm:$0xff] %v238_v6  ;;  %241 = vst [vmem:[%s164_s26 + $0x38] sm:$0xff] %v240_v7  ;;  %v244_v9 = vld [vmem:[%s1575_s28 + $0x90] sm:$0xff] }
  0x22   : > { %243 = vst [vmem:[%s164_s26 + $0x40] sm:$0xff] %v242_v8  ;;  %v246_v10 = vld [vmem:[%s1575_s28 + $0xa0] sm:$0xff]  ;;  %v248_v11 = vld [vmem:[%s1575_s28 + $0xb0] sm:$0xff]  ;;  %245 = vst [vmem:[%s164_s26 + $0x48] sm:$0xff] %v244_v9 }
  0x23   : > { %247 = vst [vmem:[%s164_s26 + $0x50] sm:$0xff] %v246_v10  ;;  %249 = vst [vmem:[%s164_s26 + $0x58] sm:$0xff] %v248_v11  ;;  %v250_v12 = vld [vmem:[%s1575_s28 + $0xc0] sm:$0xff]  ;;  %v252_v13 = vld [vmem:[%s1575_s28 + $0xd0] sm:$0xff] }
  0x24   : > { %v254_v14 = vld [vmem:[%s1575_s28 + $0xe0] sm:$0xff]  ;;  %251 = vst [vmem:[%s164_s26 + $0x60] sm:$0xff] %v250_v12  ;;  %253 = vst [vmem:[%s164_s26 + $0x68] sm:$0xff] %v252_v13  ;;  %v256_v15 = vld [vmem:[%s1575_s28 + $0xf0] sm:$0xff] }
  0x25   : > { %255 = vst [vmem:[%s164_s26 + $0x70] sm:$0xff] %v254_v14  ;;  %257 = vst [vmem:[%s164_s26 + $0x78] sm:$0xff] %v256_v15 }
  0x26 PF: > { %p1053_p0 = scmp.ge.s32.totalorder %s1450_s21, 1  ;;  %p270_p1 = scmp.lt.s32.totalorder %s1450_s21, 5 }
  0x28   : > { %p271_p2 = pnand %p1053_p0, %p270_p1 }
  0x29   : > { %s277_s27 = sand.u32 (!%p271_p2), 1, %s1426_s15   ;;  %s1056_s15 = sshll.u32 (!%p271_p2), %s1434_s17, 5 }
  0x2a   : > { %274 = sbr.rel (%p271_p2) target bundleno = 398 (0x18e), region = 66  ;;  %s1054_s29 = sshll.u32 (!%p271_p2), %s277_s27, 7 }
  0x2b   : > { %s1598_s4 = scalar_lea.vmem (!%p271_p2), [#allocation2], %s1054_s29  ;;  %p310_p3 = scmp.lt.s32.totalorder (!%p271_p2), %s1056_s15, 63 }
  0x2c   : > { %s1058_s22 = sshll.u32 (!%p271_p2), %s1438_s18, 1  ;;  %s306_s27 = sand.u32 (!%p271_p2), 1, %s1418_s13  }
  0x2d   : > { %p317_p4 = scmp.lt.s32.totalorder (!%p271_p2), %s1058_s22, 3  ;;  %s1751_s29 = sshll.u32 (!%p271_p2), %s306_s27, 8 }
  0x2e   : > { %s1453_s28 = smov (!%p271_p2), [#allocation3]  }
  0x2f   : > { %v1452_v16 = vmov 0   ;;  %v1190_v17 = vld [vmem:[%s1598_s4 + $0x74] ss:$8 sps:$4 sm:$0xff]   ;;  %v1192_v18 = vld [vmem:[%s1598_s4 + $0x70] ss:$8 sps:$4 sm:$0xff]   ;;  %s1997_s15 = smov (!%p310_p3, %s1056_s15), 63 }
  0x30   : > { %511 = vmatprep.mubr.bf16.mxu0 %v1452_v16  ;;  %591 = vmatprep.mubr.bf16.mxu1 %v1452_v16  ;;  %v1193_v19 = vld [vmem:[%s1598_s4 + $0x64] ss:$8 sps:$4 sm:$0xff]   ;;  %v1195_v20 = vld [vmem:[%s1598_s4 + $0x60] ss:$8 sps:$4 sm:$0xff]   ;;  %v1196_v21 = vld [vmem:[%s1598_s4 + $0x54] ss:$8 sps:$4 sm:$0xff]  }
  0x31   : > { %479 = vmatprep.subr.bf16.mxu0 %v1190_v17  ;;  %1083 = vmatprep.subr.bf16.mxu1 %v1190_v17  ;;  %v1198_v22 = vld [vmem:[%s1598_s4 + $0x50] ss:$8 sps:$4 sm:$0xff]   ;;  %v1199_v23 = vld [vmem:[%s1598_s4 + $0x44] ss:$8 sps:$4 sm:$0xff]   ;;  %v1201_v24 = vld [vmem:[%s1598_s4 + $0x40] ss:$8 sps:$4 sm:$0xff]  }
  0x32   : > { %480 = vmatpush1.bf16.msra.mxu0 %v1192_v18  ;;  %1091 = vmatpush1.bf16.msra.mxu1 %v1192_v18  ;;  %v1202_v25 = vld [vmem:[%s1598_s4 + $0x34] ss:$8 sps:$4 sm:$0xff]   ;;  %v1204_v26 = vld [vmem:[%s1598_s4 + $0x30] ss:$8 sps:$4 sm:$0xff]   ;;  %v1205_v27 = vld [vmem:[%s1598_s4 + $0x24] ss:$8 sps:$4 sm:$0xff]   ;;  %v389_v18 = vlaneseq }
  0x33   : > { %481 = vmatprep.subr.bf16.mxu0 %v1193_v19  ;;  %1084 = vmatprep.subr.bf16.mxu1 %v1193_v19  ;;  %v1207_v28 = vld [vmem:[%s1598_s4 + $0x20] ss:$8 sps:$4 sm:$0xff]   ;;  %v1208_v29 = vld [vmem:[%s1598_s4 + $0x14] ss:$8 sps:$4 sm:$0xff]   ;;  %s1057_s5 = sshll.u32 %s1997_s15, 3  ;;  %s1999_s22 = smov (!%p317_p4, %s1058_s22), 3 }
  0x34   : > { %v1210_v30 = vld [vmem:[%s1598_s4 + $0x10] ss:$8 sps:$4 sm:$0xff]   ;;  %s1618_s11 = scalar_lea.vmem %s1974_s0, %s1057_s5  ;;  %v1211_v31 = vld [vmem:[%s1598_s4 + $0x4] ss:$8 sps:$4 sm:$0xff]   ;;  %v1213_v32 = vld [vmem:[%s1598_s4] ss:$8 sps:$4 sm:$0xff]   ;;  %s319_s26 = scalar_lea.vmem %s1976_s2, %s1999_s22 }
  0x35   : > { %v323_v33 = vld [vmem:[%s1618_s11] sm:$0xff]  ;;  %v324_v34 = vld [vmem:[%s1618_s11 + $0x8] sm:$0xff]  ;;  %v325_v39 = vld [vmem:[%s1618_s11 + $0x10] sm:$0xff]  ;;  %v1669_v19 = vshrl.u32 %v389_v18, 7  ;;  %s1769_s4 = scalar_lea.vmem [#allocation3], %s1751_s29  ;;  %s1082_s15 = sshll.u32 %s1434_s17, 6 }
  0x36   : > { %482 = vmatpush1.bf16.msra.mxu0 %v1195_v20  ;;  %1092 = vmatpush1.bf16.msra.mxu1 %v1195_v20  ;;  %v339_v35 = vld [vmem:[%s1618_s11 + $0x80] sm:$0xff]  ;;  %v340_v36 = vld [vmem:[%s1618_s11 + $0x88] sm:$0xff]  ;;  %v355_v37 = vpack.c.bf16 %v324_v34, %v323_v33  ;;  %v326_v40 = vld [vmem:[%s1618_s11 + $0x18] sm:$0xff]  ;;  %s941_s5 = sadd.s32 %s1438_s18, %s1082_s15  ;;  %s944_s9 = sshll.u32 %s1769_s4, 4  ;;  %s1911_s9 = int_to_ptr.vmem [resolvable:$true] %s944_s9 }
  0x37   : > { %483 = vmatprep.subr.bf16.mxu0 %v1196_v21  ;;  %1085 = vmatprep.subr.bf16.mxu1 %v1196_v21  ;;  %v363_v38 = vpack.c.bf16 %v340_v36, %v339_v35  ;;  %v341_v41 = vld [vmem:[%s1618_s11 + $0x90] sm:$0xff]  ;;  %v342_v42 = vld [vmem:[%s1618_s11 + $0x98] sm:$0xff]  ;;  %v356_v43 = vpack.c.bf16 %v326_v40, %v325_v39  ;;  %v327_v45 = vld [vmem:[%s1618_s11 + $0x20] sm:$0xff]  ;;  %v395_v20 = vsub.s32 1, %v1669_v19  ;;  %s1078_s17 = sshll.u32 %s941_s5, 7  ;;  %s1917_s22 = scalar_lea.sflag [#allocation4], %s306_s27 }
  0x38   : > { %v364_v44 = vpack.c.bf16 %v342_v42, %v341_v41  ;;  %v328_v46 = vld [vmem:[%s1618_s11 + $0x28] sm:$0xff]  ;;  %v343_v47 = vld [vmem:[%s1618_s11 + $0xa0] sm:$0xff]  ;;  %v329_v51 = vld [vmem:[%s1618_s11 + $0x30] sm:$0xff]  ;;  %s1342_s23 = scalar_lea.vmem %s1911_s9, 4096 }
  0x39   : > { %v344_v48 = vld [vmem:[%s1618_s11 + $0xa8] sm:$0xff]  ;;  %v357_v49 = vpack.c.bf16 %v328_v46, %v327_v45  ;;  %v330_v52 = vld [vmem:[%s1618_s11 + $0x38] sm:$0xff]  ;;  %v345_v53 = vld [vmem:[%s1618_s11 + $0xb0] sm:$0xff]  ;;  %p1343_p5 = scmp.ne.s32.totalorder %s1911_s9, %s1342_s23 }
  0x3a   : > { %484 = vmatpush1.bf16.msra.mxu0 %v1198_v22  ;;  %1093 = vmatpush1.bf16.msra.mxu1 %v1198_v22  ;;  %v365_v50 = vpack.c.bf16 %v344_v48, %v343_v47  ;;  %v346_v54 = vld [vmem:[%s1618_s11 + $0xb8] sm:$0xff]  ;;  %v358_v55 = vpack.c.bf16 %v330_v52, %v329_v51  ;;  %v331_v57 = vld [vmem:[%s1618_s11 + $0x40] sm:$0xff]  ;;  %v332_v58 = vld [vmem:[%s1618_s11 + $0x48] sm:$0xff] }
  0x3b   : > { %485 = vmatprep.subr.bf16.mxu0 %v1199_v23  ;;  %1086 = vmatprep.subr.bf16.mxu1 %v1199_v23  ;;  %v366_v56 = vpack.c.bf16 %v346_v54, %v345_v53  ;;  %v347_v59 = vld [vmem:[%s1618_s11 + $0xc0] sm:$0xff]  ;;  %v348_v60 = vld [vmem:[%s1618_s11 + $0xc8] sm:$0xff]  ;;  %v359_v61 = vpack.c.bf16 %v332_v58, %v331_v57  ;;  %v333_v63 = vld [vmem:[%s1618_s11 + $0x50] sm:$0xff]  ;;  %p1344_p6 = pnand %p1343_p5, %p1549_p7 }
  0x3c   : > { %v367_v62 = vpack.c.bf16 %v348_v60, %v347_v59  ;;  %v334_v0 = vld [vmem:[%s1618_s11 + $0x58] sm:$0xff]  ;;  %v349_v1 = vld [vmem:[%s1618_s11 + $0xd0] sm:$0xff]  ;;  %v335_v5 = vld [vmem:[%s1618_s11 + $0x60] sm:$0xff] }
  0x3d   : > { %v350_v2 = vld [vmem:[%s1618_s11 + $0xd8] sm:$0xff]  ;;  %v360_v3 = vpack.c.bf16 %v334_v0, %v333_v63  ;;  %v336_v6 = vld [vmem:[%s1618_s11 + $0x68] sm:$0xff]  ;;  %v351_v7 = vld [vmem:[%s1618_s11 + $0xe0] sm:$0xff]  ;;  %p1345_p8 = pneg %p1344_p6 }
  0x3e   : > { %486 = vmatpush1.bf16.msra.mxu0 %v1201_v24  ;;  %1094 = vmatpush1.bf16.msra.mxu1 %v1201_v24  ;;  %v368_v4 = vpack.c.bf16 %v350_v2, %v349_v1  ;;  %v352_v8 = vld [vmem:[%s1618_s11 + $0xe8] sm:$0xff]  ;;  %v361_v9 = vpack.c.bf16 %v336_v6, %v335_v5  ;;  %v337_v11 = vld [vmem:[%s1618_s11 + $0x70] sm:$0xff]  ;;  %v338_v12 = vld [vmem:[%s1618_s11 + $0x78] sm:$0xff] }
  0x3f   : > { %487 = vmatprep.subr.bf16.mxu0 %v1202_v25  ;;  %1087 = vmatprep.subr.bf16.mxu1 %v1202_v25  ;;  %v369_v10 = vpack.c.bf16 %v352_v8, %v351_v7  ;;  %v353_v13 = vld [vmem:[%s1618_s11 + $0xf0] sm:$0xff]  ;;  %v354_v14 = vld [vmem:[%s1618_s11 + $0xf8] sm:$0xff]  ;;  %v362_v15 = vpack.c.bf16 %v338_v12, %v337_v11  ;;  %s1909_s11 = scalar_lea.hbm %s1977_s3, %s1078_s17 }
  0x40   : > { %v370_v17 = vpack.c.bf16 %v354_v14, %v353_v13 }
  0x42   : > { %488 = vmatpush1.bf16.msra.mxu0 %v1204_v26  ;;  %1095 = vmatpush1.bf16.msra.mxu1 %v1204_v26 }
  0x43   : > { %489 = vmatprep.subr.bf16.mxu0 %v1205_v27  ;;  %1088 = vmatprep.subr.bf16.mxu1 %v1205_v27 }
  0x46   : > { %490 = vmatpush1.bf16.msra.mxu0 %v1207_v28  ;;  %1096 = vmatpush1.bf16.msra.mxu1 %v1207_v28 }
  0x47   : > { %491 = vmatprep.subr.bf16.mxu0 %v1208_v29  ;;  %1089 = vmatprep.subr.bf16.mxu1 %v1208_v29 }
  0x4a   : > { %492 = vmatpush1.bf16.msra.mxu0 %v1210_v30  ;;  %1097 = vmatpush1.bf16.msra.mxu1 %v1210_v30 }
  0x4b   : > { %493 = vmatprep.subr.bf16.mxu0 %v1211_v31  ;;  %1090 = vmatprep.subr.bf16.mxu1 %v1211_v31 }
  0x4e   : > { %494 = vmatpush1.bf16.msra.mxu0 %v1213_v32  ;;  %1098 = vmatpush1.bf16.msra.mxu1 %v1213_v32 }
  0x51   : > { %512 = vmatmul.mubr.bf16.vlgmr.msra.gmra.mxu0 %v355_v37  ;;  %592 = vmatmul.mubr.bf16.vlgmr.msra.gmra.mxu1 %v363_v38 }
  0x52   : > { %521 = vmatprep.mubr.bf16.mxu0 %v1452_v16  ;;  %601 = vmatprep.mubr.bf16.mxu1 %v1452_v16 }
  0x59   : > { %522 = vmatmul.mubr.bf16.gmra.mxu0 %v356_v43  ;;  %602 = vmatmul.mubr.bf16.gmra.mxu1 %v364_v44 }
  0x5a   : > { %531 = vmatprep.mubr.bf16.mxu0 %v1452_v16  ;;  %611 = vmatprep.mubr.bf16.mxu1 %v1452_v16 }
  0x61   : > { %532 = vmatmul.mubr.bf16.gmra.mxu0 %v357_v49  ;;  %612 = vmatmul.mubr.bf16.gmra.mxu1 %v365_v50 }
  0x62   : > { %541 = vmatprep.mubr.bf16.mxu0 %v1452_v16  ;;  %621 = vmatprep.mubr.bf16.mxu1 %v1452_v16 }
  0x69   : > { %542 = vmatmul.mubr.bf16.gmra.mxu0 %v358_v55  ;;  %622 = vmatmul.mubr.bf16.gmra.mxu1 %v366_v56 }
  0x6a   : > { %551 = vmatprep.mubr.bf16.mxu0 %v1452_v16  ;;  %631 = vmatprep.mubr.bf16.mxu1 %v1452_v16 }
  0x71   : > { %552 = vmatmul.mubr.bf16.gmra.mxu0 %v359_v61  ;;  %632 = vmatmul.mubr.bf16.gmra.mxu1 %v367_v62 }
  0x72   : > { %561 = vmatprep.mubr.bf16.mxu0 %v1452_v16  ;;  %641 = vmatprep.mubr.bf16.mxu1 %v1452_v16 }
  0x79   : > { %562 = vmatmul.mubr.bf16.gmra.mxu0 %v360_v3  ;;  %642 = vmatmul.mubr.bf16.gmra.mxu1 %v368_v4 }
  0x7a   : > { %571 = vmatprep.mubr.bf16.mxu0 %v1452_v16  ;;  %651 = vmatprep.mubr.bf16.mxu1 %v1452_v16 }
  0x81   : > { %572 = vmatmul.mubr.bf16.gmra.mxu0 %v361_v9  ;;  %652 = vmatmul.mubr.bf16.gmra.mxu1 %v369_v10  ;;  %v391_v9 = vsub.s32 0, %v1669_v19 }
  0x82   : > { %581 = vmatprep.mubr.bf16.mxu0 %v1452_v16  ;;  %661 = vmatprep.mubr.bf16.mxu1 %v1452_v16  ;;  %v1675_v16 = vld [vmem:[%s319_s26] sm:$0x3]  ;;  %s1346_s26 = sshll.u32 %s1453_s28, 4  ;;  %s1347_s26 = int_to_ptr.vmem [resolvable:$false] %s1346_s26 }
  0x83   : > { %v1678_v21 = vrot.slane %v1675_v16, %v395_v20  ;;  %v1722_v19 = vrot.slane %v1675_v16, %v391_v9  ;;  %s1348_s29 = scalar_lea.vmem %s1347_s26, 8192  ;;  %p1349_p9 = scmp.lt.s32.totalorder %s1911_s9, %s1347_s26 }
  0x84   : > { %p1350_p10 = scmp.lt.s32.totalorder %s1348_s29, %s1342_s23 }
  0x86   : > { %p1351_p11 = por %p1350_p10, %p1349_p9 }
  0x88   : > { %p1352_p13 = pnand %p1351_p11, %p1345_p8 }
  0x89   : > { %582 = vmatmul.mubr.bf16.gmra.mxu0 %v362_v15  ;;  %662 = vmatmul.mubr.bf16.gmra.mxu1 %v370_v17 }
 0x111   : > { %v1680_v22 = vpop.f32.mrf.mxu0  ;;  %v1682_v23 = vpop.f32.mrf.mxu1 }
 0x113   : > { %v515_v24 = vpop.f32.mrf.mxu0  ;;  %v595_v25 = vpop.f32.mrf.mxu1 }
 0x114   : > { %v516_v26 = vadd.f32 %v515_v24, %v1678_v21  ;;  %v596_v27 = vadd.f32 %v595_v25, %v1678_v21 }
 0x115   : > { %v1686_v28 = vpop.f32.mrf.mxu0  ;;  %v1688_v29 = vpop.f32.mrf.mxu1 }
 0x116   : > { %v704_v30 = vsub.f32 0.0, %v516_v26  ;;  %v720_v31 = vsub.f32 0.0, %v596_v27 }
 0x117   : > { %v519_v32 = vpop.f32.mrf.mxu0  ;;  %v599_v33 = vpop.f32.mrf.mxu1 }
 0x118   : > { %v736_v34 = vmul.f32 1.442695, %v704_v30  ;;  %v768_v35 = vmul.f32 1.442695, %v720_v31  ;;  %v520_v36 = vadd.f32 %v519_v32, %v1678_v21  ;;  %v600_v37 = vadd.f32 %v599_v33, %v1678_v21 }
 0x119   : > { %v1692_v38 = vpop.f32.mrf.mxu0  ;;  %v1694_v39 = vpop.f32.mrf.mxu1 }
 0x11a   : > { %1214 = vpow2.f32 %v736_v34  ;;  %v705_v40 = vsub.f32 0.0, %v520_v36  ;;  %v721_v41 = vsub.f32 0.0, %v600_v37 }
 0x11b   : > { %1216 = vpow2.f32 %v768_v35  ;;  %v525_v42 = vpop.f32.mrf.mxu0  ;;  %v605_v43 = vpop.f32.mrf.mxu1 }
 0x11c   : > { %v526_v44 = vadd.f32 %v525_v42, %v1678_v21  ;;  %v606_v45 = vadd.f32 %v605_v43, %v1678_v21  ;;  %v738_v46 = vmul.f32 1.442695, %v705_v40  ;;  %v770_v47 = vmul.f32 1.442695, %v721_v41 }
 0x11d   : > { %v1698_v48 = vpop.f32.mrf.mxu0  ;;  %v1700_v49 = vpop.f32.mrf.mxu1  ;;  %v514_v43 = vadd.f32 %v1680_v22, %v1722_v19 }
 0x11e   : > { %v706_v50 = vsub.f32 0.0, %v526_v44  ;;  %v722_v51 = vsub.f32 0.0, %v606_v45  ;;  %1218 = vpow2.f32 %v738_v46  ;;  %v594_v44 = vadd.f32 %v1682_v23, %v1722_v19 }
 0x11f   : > { %v529_v52 = vpop.f32.mrf.mxu0  ;;  %v609_v53 = vpop.f32.mrf.mxu1  ;;  %1220 = vpow2.f32 %v770_v47 }
 0x120   : > { %v740_v54 = vmul.f32 1.442695, %v706_v50  ;;  %v772_v55 = vmul.f32 1.442695, %v722_v51  ;;  %v530_v56 = vadd.f32 %v529_v52, %v1678_v21  ;;  %v610_v57 = vadd.f32 %v609_v53, %v1678_v21 }
 0x121   : > { %v1704_v58 = vpop.f32.mrf.mxu0  ;;  %v1706_v59 = vpop.f32.mrf.mxu1 }
 0x122   : > { %1222 = vpow2.f32 %v740_v54  ;;  %v707_v60 = vsub.f32 0.0, %v530_v56  ;;  %v723_v61 = vsub.f32 0.0, %v610_v57  ;;  %v1737_v54 = vadd.f32 %v1686_v28, %v1722_v19 }
 0x123   : > { %1224 = vpow2.f32 %v772_v55  ;;  %v535_v62 = vpop.f32.mrf.mxu0  ;;  %v615_v63 = vpop.f32.mrf.mxu1 }
 0x124   : > { %v536_v0 = vadd.f32 %v535_v62, %v1678_v21  ;;  %v616_v1 = vadd.f32 %v615_v63, %v1678_v21  ;;  %v742_v2 = vmul.f32 1.442695, %v707_v60  ;;  %v774_v3 = vmul.f32 1.442695, %v723_v61 }
 0x125   : > { %v1710_v4 = vpop.f32.mrf.mxu0  ;;  %v1712_v5 = vpop.f32.mrf.mxu1  ;;  %v672_v62 = vmax.f32 %v514_v43, 0.0  ;;  %v1747_v63 = vadd.f32 %v1688_v29, %v1722_v19  ;;  %v673_v9 = vmax.f32 %v1737_v54, 0.0 }
 0x126   : > { %v708_v6 = vsub.f32 0.0, %v536_v0  ;;  %v724_v7 = vsub.f32 0.0, %v616_v1  ;;  %1226 = vpow2.f32 %v742_v2 }
 0x127   : > { %v1215_v8 = vpop.eup %1214  ;;  %v539_v10 = vpop.f32.mrf.mxu0  ;;  %1228 = vpow2.f32 %v774_v3 }
 0x128   : > { %v619_v11 = vpop.f32.mrf.mxu1  ;;  %v1217_v12 = vpop.eup %1216  ;;  %v800_v13 = vadd.f32 1.0, %v1215_v8  ;;  %v744_v14 = vmul.f32 1.442695, %v708_v6  ;;  %v776_v17 = vmul.f32 1.442695, %v724_v7  ;;  %v540_v18 = vadd.f32 %v539_v10, %v1678_v21 }
 0x129   : > { %v816_v15 = vadd.f32 1.0, %v1217_v12  ;;  %v1716_v20 = vpop.f32.mrf.mxu0  ;;  %v620_v25 = vadd.f32 %v619_v11, %v1678_v21  ;;  %v688_v8 = vmax.f32 %v594_v44, 0.0  ;;  %v1776_v44 = vadd.f32 %v1698_v48, %v1722_v19 }
 0x12a   : > { %v1718_v24 = vpop.f32.mrf.mxu1  ;;  %1230 = vrcp.f32 %v800_v13  ;;  %v709_v26 = vsub.f32 0.0, %v540_v18 }
 0x12b   : > { %1232 = vrcp.f32 %v816_v15  ;;  %v545_v27 = vpop.f32.mrf.mxu0  ;;  %v1219_v31 = vpop.eup %1218  ;;  %v725_v32 = vsub.f32 0.0, %v620_v25 }
 0x12c   : > { %v625_v30 = vpop.f32.mrf.mxu1  ;;  %1234 = vpow2.f32 %v744_v14  ;;  %v1221_v33 = vpop.eup %1220  ;;  %v801_v34 = vadd.f32 1.0, %v1219_v31  ;;  %v746_v35 = vmul.f32 1.442695, %v709_v26  ;;  %v546_v36 = vadd.f32 %v545_v27, %v1678_v21 }
 0x12d   : > { %1236 = vpow2.f32 %v776_v17  ;;  %v1725_v37 = vpop.f32.mrf.mxu0  ;;  %v817_v16 = vadd.f32 1.0, %v1221_v33  ;;  %v626_v41 = vadd.f32 %v625_v30, %v1678_v21  ;;  %v778_v52 = vmul.f32 1.442695, %v725_v32 }
 0x12e   : > { %v1727_v40 = vpop.f32.mrf.mxu1  ;;  %1238 = vrcp.f32 %v801_v34  ;;  %v710_v45 = vsub.f32 0.0, %v546_v36  ;;  %v689_v17 = vmax.f32 %v1747_v63, 0.0  ;;  %v524_v32 = vadd.f32 %v1692_v38, %v1722_v19 }
 0x12f   : > { %v1223_v42 = vpop.eup %1222  ;;  %v549_v46 = vpop.f32.mrf.mxu0  ;;  %1240 = vrcp.f32 %v817_v16  ;;  %v726_v53 = vsub.f32 0.0, %v626_v41  ;;  %v604_v38 = vadd.f32 %v1694_v39, %v1722_v19 }
 0x130   : > { %v629_v47 = vpop.f32.mrf.mxu1  ;;  %v1225_v50 = vpop.eup %1224  ;;  %v802_v51 = vadd.f32 1.0, %v1223_v42  ;;  %1242 = vpow2.f32 %v746_v35  ;;  %v748_v22 = vmul.f32 1.442695, %v710_v45  ;;  %v550_v60 = vadd.f32 %v549_v46, %v1678_v21 }
 0x131   : > { %v818_v55 = vadd.f32 1.0, %v1225_v50  ;;  %v1739_v56 = vpop.f32.mrf.mxu0  ;;  %v780_v57 = vmul.f32 1.442695, %v726_v53  ;;  %v630_v61 = vadd.f32 %v629_v47, %v1678_v21  ;;  %v674_v54 = vmax.f32 %v524_v32, 0.0 }
 0x132   : > { %v1741_v23 = vpop.f32.mrf.mxu1  ;;  %1244 = vrcp.f32 %v802_v51  ;;  %v711_v2 = vsub.f32 0.0, %v550_v60 }
 0x133   : > { %1246 = vrcp.f32 %v818_v55  ;;  %v555_v28 = vpop.f32.mrf.mxu0  ;;  %v1227_v1 = vpop.eup %1226  ;;  %v727_v3 = vsub.f32 0.0, %v630_v61  ;;  %v1781_v55 = vadd.f32 %v1700_v49, %v1722_v19 }
 0x134   : > { %v635_v0 = vpop.f32.mrf.mxu1  ;;  %1248 = vpow2.f32 %v778_v52  ;;  %v556_v6 = vadd.f32 %v555_v28, %v1678_v21  ;;  %v1229_v7 = vpop.eup %1228  ;;  %v803_v10 = vadd.f32 1.0, %v1227_v1  ;;  %v750_v13 = vmul.f32 1.442695, %v711_v2 }
 0x135   : > { %1250 = vpow2.f32 %v748_v22  ;;  %v1755_v29 = vpop.f32.mrf.mxu0  ;;  %v819_v12 = vadd.f32 1.0, %v1229_v7  ;;  %v782_v14 = vmul.f32 1.442695, %v727_v3  ;;  %v636_v25 = vadd.f32 %v635_v0, %v1678_v21 }
 0x136   : > { %v1757_v11 = vpop.f32.mrf.mxu1  ;;  %1252 = vpow2.f32 %v780_v57  ;;  %v712_v18 = vsub.f32 0.0, %v556_v6  ;;  %v690_v0 = vmax.f32 %v604_v38, 0.0  ;;  %v675_v2 = vmax.f32 %v1776_v44, 0.0 }
 0x137   : > { %v1231_v15 = vpop.eup %1230  ;;  %1254 = vrcp.f32 %v803_v10  ;;  %v559_v26 = vpop.f32.mrf.mxu0  ;;  %v728_v16 = vsub.f32 0.0, %v636_v25 }
 0x138   : > { %v639_v27 = vpop.f32.mrf.mxu1  ;;  %v1233_v30 = vpop.eup %1232  ;;  %v864_v31 = vmul.f32 %v1231_v15, %v672_v62  ;;  %1256 = vrcp.f32 %v819_v12  ;;  %v560_v33 = vadd.f32 %v559_v26, %v1678_v21  ;;  %v752_v36 = vmul.f32 1.442695, %v712_v18 }
 0x139   : > { %v1235_v34 = vpop.eup %1234  ;;  %v880_v35 = vmul.f32 %v1233_v30, %v688_v8  ;;  %1258 = vpow2.f32 %v750_v13  ;;  %v1764_v41 = vpop.f32.mrf.mxu0  ;;  %v784_v47 = vmul.f32 1.442695, %v728_v16  ;;  %v640_v39 = vadd.f32 %v639_v27, %v1678_v21 }
 0x13a   : > { %v1766_v42 = vpop.f32.mrf.mxu1  ;;  %v1237_v43 = vpop.eup %1236  ;;  %896 = vst [vmem:[%s1769_s4] sm:$0xff] %v864_v31  ;;  %v804_v45 = vadd.f32 1.0, %v1235_v34  ;;  %1260 = vpow2.f32 %v782_v14  ;;  %v713_v50 = vsub.f32 0.0, %v560_v33  ;;  %v691_v12 = vmax.f32 %v1781_v55, 0.0 }
 0x13b   : > { %912 = vst [vmem:[%s1769_s4 + $0x80] sm:$0xff] %v880_v35  ;;  %v820_v46 = vadd.f32 1.0, %v1237_v43  ;;  %1262 = vpow2.f32 %v752_v36  ;;  %v565_v51 = vpop.f32.mrf.mxu0  ;;  %v1239_v53 = vpop.eup %1238  ;;  %v729_v49 = vsub.f32 0.0, %v640_v39  ;;  %v534_v18 = vadd.f32 %v1704_v58, %v1722_v19 }
 0x13c   : > { %v645_v52 = vpop.f32.mrf.mxu1  ;;  %1264 = vrcp.f32 %v804_v45  ;;  %v1241_v48 = vpop.eup %1240  ;;  %v865_v22 = vmul.f32 %v1239_v53, %v673_v9  ;;  %v754_v57 = vmul.f32 1.442695, %v713_v50  ;;  %v566_v60 = vadd.f32 %v565_v51, %v1678_v21 }
 0x13d   : > { %1266 = vrcp.f32 %v820_v46  ;;  %v1785_v61 = vpop.f32.mrf.mxu0  ;;  %v1243_v63 = vpop.eup %1242  ;;  %v881_v28 = vmul.f32 %v1241_v48, %v689_v17  ;;  %v786_v13 = vmul.f32 1.442695, %v729_v49  ;;  %v646_v14 = vadd.f32 %v645_v52, %v1678_v21 }
 0x13e   : > { %v1787_v62 = vpop.f32.mrf.mxu1  ;;  %1268 = vpow2.f32 %v784_v47  ;;  %897 = vst [vmem:[%s1769_s4 + $0x8] sm:$0xff] %v865_v22  ;;  %v805_v3 = vadd.f32 1.0, %v1243_v63  ;;  %v714_v6 = vsub.f32 0.0, %v566_v60  ;;  %v614_v31 = vadd.f32 %v1706_v59, %v1722_v19 }
 0x13f   : > { %v1245_v1 = vpop.eup %1244  ;;  %1270 = vpow2.f32 %v754_v57  ;;  %v569_v7 = vpop.f32.mrf.mxu0  ;;  %913 = vst [vmem:[%s1769_s4 + $0x88] sm:$0xff] %v881_v28  ;;  %v730_v33 = vsub.f32 0.0, %v646_v14  ;;  %v1806_v35 = vadd.f32 %v1710_v4, %v1722_v19  ;;  %v676_v50 = vmax.f32 %v534_v18, 0.0 }
 0x140   : > { %v649_v8 = vpop.f32.mrf.mxu1  ;;  %v1247_v9 = vpop.eup %1246  ;;  %v866_v10 = vmul.f32 %v1245_v1, %v674_v54  ;;  %1272 = vrcp.f32 %v805_v3  ;;  %v756_v25 = vmul.f32 1.442695, %v714_v6  ;;  %v570_v36 = vadd.f32 %v569_v7, %v1678_v21 }
 0x141   : > { %v1249_v15 = vpop.eup %1248  ;;  %v882_v17 = vmul.f32 %v1247_v9, %v690_v0  ;;  %v1796_v26 = vpop.f32.mrf.mxu0  ;;  %1274 = vpow2.f32 %v786_v13  ;;  %v788_v59 = vmul.f32 1.442695, %v730_v33  ;;  %v650_v45 = vadd.f32 %v649_v8, %v1678_v21 }
 0x142   : > { %v1798_v27 = vpop.f32.mrf.mxu1  ;;  %v1251_v30 = vpop.eup %1250  ;;  %898 = vst [vmem:[%s1769_s4 + $0x10] sm:$0xff] %v866_v10  ;;  %v821_v32 = vadd.f32 1.0, %v1249_v15  ;;  %1276 = vpow2.f32 %v756_v25  ;;  %v715_v51 = vsub.f32 0.0, %v570_v36  ;;  %v692_v55 = vmax.f32 %v614_v31, 0.0 }
 0x143   : > { %v1253_v34 = vpop.eup %1252  ;;  %914 = vst [vmem:[%s1769_s4 + $0x90] sm:$0xff] %v882_v17  ;;  %v806_v58 = vadd.f32 1.0, %v1251_v30  ;;  %v575_v16 = vpop.f32.mrf.mxu0  ;;  %v731_v39 = vsub.f32 0.0, %v650_v45  ;;  %v677_v22 = vmax.f32 %v1806_v35, 0.0  ;;  %v1818_v57 = vadd.f32 %v1712_v5, %v1722_v19 }
 0x144   : > { %v655_v43 = vpop.f32.mrf.mxu1  ;;  %v1255_v38 = vpop.eup %1254  ;;  %1278 = vrcp.f32 %v821_v32  ;;  %v822_v44 = vadd.f32 1.0, %v1253_v34  ;;  %v1823_v49 = vadd.f32 %v1716_v20, %v1722_v19  ;;  %v576_v3 = vadd.f32 %v575_v16, %v1678_v21 }
 0x145   : > { %v1257_v46 = vpop.eup %1256  ;;  %v867_v47 = vmul.f32 %v1255_v38, %v675_v2  ;;  %1280 = vrcp.f32 %v806_v58  ;;  %v1810_v4 = vpop.f32.mrf.mxu0  ;;  %v758_v2 = vmul.f32 1.442695, %v715_v51  ;;  %v790_v8 = vmul.f32 1.442695, %v731_v39 }
 0x146   : > { %v1812_v52 = vpop.f32.mrf.mxu1  ;;  %v1259_v53 = vpop.eup %1258  ;;  %v883_v54 = vmul.f32 %v1257_v46, %v691_v12  ;;  %1282 = vrcp.f32 %v822_v44  ;;  %v656_v5 = vadd.f32 %v655_v43, %v1678_v21  ;;  %v624_v20 = vadd.f32 %v1718_v24, %v1722_v19 }
 0x147   : > { %v1261_v48 = vpop.eup %1260  ;;  %899 = vst [vmem:[%s1769_s4 + $0x18] sm:$0xff] %v867_v47  ;;  %v807_v60 = vadd.f32 1.0, %v1259_v53  ;;  %1284 = vpow2.f32 %v788_v59  ;;  %v579_v63 = vpop.f32.mrf.mxu0  ;;  %v716_v14 = vsub.f32 0.0, %v576_v3  ;;  %v693_v18 = vmax.f32 %v1818_v57, 0.0 }
 0x148   : > { %v659_v28 = vpop.f32.mrf.mxu1  ;;  %v1263_v0 = vpop.eup %1262  ;;  %915 = vst [vmem:[%s1769_s4 + $0x98] sm:$0xff] %v883_v54  ;;  %v823_v1 = vadd.f32 1.0, %v1261_v48  ;;  %v732_v25 = vsub.f32 0.0, %v656_v5  ;;  %v678_v33 = vmax.f32 %v1823_v49, 0.0  ;;  %v580_v36 = vadd.f32 %v579_v63, %v1678_v21 }
 0x149   : > { %v1265_v6 = vpop.eup %1264  ;;  %1286 = vrcp.f32 %v807_v60  ;;  %v808_v7 = vadd.f32 1.0, %v1263_v0  ;;  %v1827_v9 = vpop.f32.mrf.mxu0  ;;  %v760_v35 = vmul.f32 1.442695, %v716_v14  ;;  %v694_v43 = vmax.f32 %v624_v20, 0.0 }
 0x14a   : > { %v1829_v10 = vpop.f32.mrf.mxu1  ;;  %v1267_v12 = vpop.eup %1266  ;;  %v868_v13 = vmul.f32 %v1265_v6, %v676_v50  ;;  %1288 = vrcp.f32 %v823_v1  ;;  %v792_v58 = vmul.f32 1.442695, %v732_v25  ;;  %v548_v38 = vadd.f32 %v1725_v37, %v1722_v19 }
 0x14b   : > { %v1269_v15 = vpop.eup %1268  ;;  %v884_v17 = vmul.f32 %v1267_v12, %v692_v55  ;;  %1290 = vrcp.f32 %v808_v7  ;;  %v585_v30 = vpop.f32.mrf.mxu0  ;;  %v660_v44 = vadd.f32 %v659_v28, %v1678_v21  ;;  %v717_v46 = vsub.f32 0.0, %v580_v36 }
 0x14c   : > { %v665_v31 = vpop.f32.mrf.mxu1  ;;  %v1271_v32 = vpop.eup %1270  ;;  %900 = vst [vmem:[%s1769_s4 + $0x20] sm:$0xff] %v868_v13  ;;  %v824_v34 = vadd.f32 1.0, %v1269_v15  ;;  %1292 = vpow2.f32 %v758_v2  ;;  %v586_v47 = vadd.f32 %v585_v30, %v1678_v21  ;;  %v628_v54 = vadd.f32 %v1727_v40, %v1722_v19 }
 0x14d   : > { %916 = vst [vmem:[%s1769_s4 + $0xa0] sm:$0xff] %v884_v17  ;;  %v809_v24 = vadd.f32 1.0, %v1271_v32  ;;  %1294 = vpow2.f32 %v790_v8  ;;  %v1273_v16 = vpop.eup %1272  ;;  %v1842_v50 = vpop.f32.mrf.mxu0  ;;  %v733_v37 = vsub.f32 0.0, %v660_v44  ;;  %v554_v48 = vadd.f32 %v1739_v56, %v1722_v19 }
 0x14e   : > { %1296 = vrcp.f32 %v824_v34  ;;  %v1275_v59 = vpop.eup %1274  ;;  %v869_v45 = vmul.f32 %v1273_v16, %v677_v22  ;;  %v1844_v51 = vpop.f32.mrf.mxu1  ;;  %v762_v57 = vmul.f32 1.442695, %v717_v46  ;;  %v718_v0 = vsub.f32 0.0, %v586_v47 }
 0x14f   : > { %1298 = vrcp.f32 %v809_v24  ;;  %v1277_v53 = vpop.eup %1276  ;;  %v825_v55 = vadd.f32 1.0, %v1275_v59  ;;  %v794_v28 = vmul.f32 1.442695, %v733_v37  ;;  %v679_v1 = vmax.f32 %v548_v38, 0.0  ;;  %v589_v3 = vpop.f32.mrf.mxu0 }
 0x150   : > { %1300 = vpow2.f32 %v760_v35  ;;  %901 = vst [vmem:[%s1769_s4 + $0x28] sm:$0xff] %v869_v45  ;;  %v810_v22 = vadd.f32 1.0, %v1277_v53  ;;  %v666_v2 = vadd.f32 %v665_v31, %v1678_v21  ;;  %v669_v6 = vpop.f32.mrf.mxu1  ;;  %v695_v8 = vmax.f32 %v628_v54, 0.0 }
 0x151   : > { %v1279_v39 = vpop.eup %1278  ;;  %1302 = vpow2.f32 %v792_v58  ;;  %v764_v5 = vmul.f32 1.442695, %v718_v0  ;;  %v634_v12 = vadd.f32 %v1741_v23, %v1722_v19  ;;  %v680_v15 = vmax.f32 %v554_v48, 0.0 }
 0x152   : > { %v1281_v60 = vpop.eup %1280  ;;  %v885_v63 = vmul.f32 %v1279_v39, %v693_v18  ;;  %1304 = vrcp.f32 %v825_v55  ;;  %v734_v20 = vsub.f32 0.0, %v666_v2  ;;  %v590_v17 = vadd.f32 %v589_v3, %v1678_v21 }
 0x153   : > { %v1283_v49 = vpop.eup %1282  ;;  %v870_v40 = vmul.f32 %v1281_v60, %v678_v33  ;;  %1306 = vrcp.f32 %v810_v22  ;;  %v670_v18 = vadd.f32 %v669_v6, %v1678_v21  ;;  %v558_v31 = vadd.f32 %v1755_v29, %v1722_v19 }
 0x154   : > { %v1285_v56 = vpop.eup %1284  ;;  %917 = vst [vmem:[%s1769_s4 + $0xa8] sm:$0xff] %v885_v63  ;;  %v886_v7 = vmul.f32 %v1283_v49, %v694_v43  ;;  %1308 = vpow2.f32 %v762_v57  ;;  %v796_v23 = vmul.f32 1.442695, %v734_v20  ;;  %v719_v34 = vsub.f32 0.0, %v590_v17 }
 0x155   : > { %902 = vst [vmem:[%s1769_s4 + $0x30] sm:$0xff] %v870_v40  ;;  %v826_v13 = vadd.f32 1.0, %v1285_v56  ;;  %1310 = vpow2.f32 %v794_v28  ;;  %v735_v35 = vsub.f32 0.0, %v670_v18  ;;  %v696_v16 = vmax.f32 %v634_v12, 0.0 }
 0x156   : > { %v1287_v14 = vpop.eup %1286  ;;  %918 = vst [vmem:[%s1769_s4 + $0xb0] sm:$0xff] %v886_v7  ;;  %1312 = vpow2.f32 %v764_v5  ;;  %v638_v21 = vadd.f32 %v1757_v11, %v1722_v19  ;;  %v766_v29 = vmul.f32 1.442695, %v719_v34  ;;  %v681_v44 = vmax.f32 %v558_v31, 0.0 }
 0x157   : > { %v1289_v25 = vpop.eup %1288  ;;  %v871_v30 = vmul.f32 %v1287_v14, %v679_v1  ;;  %1314 = vrcp.f32 %v826_v13  ;;  %v564_v59 = vadd.f32 %v1764_v41, %v1722_v19  ;;  %v798_v46 = vmul.f32 1.442695, %v735_v35 }
 0x158   : > { %v1291_v32 = vpop.eup %1290  ;;  %v887_v33 = vmul.f32 %v1289_v25, %v695_v8  ;;  %1316 = vpow2.f32 %v796_v23  ;;  %v697_v11 = vmax.f32 %v638_v21, 0.0  ;;  %v644_v41 = vadd.f32 %v1766_v42, %v1722_v19 }
 0x159   : > { %v1293_v24 = vpop.eup %1292  ;;  %903 = vst [vmem:[%s1769_s4 + $0x38] sm:$0xff] %v871_v30  ;;  %v872_v58 = vmul.f32 %v1291_v32, %v680_v15  ;;  %v682_v22 = vmax.f32 %v564_v59, 0.0  ;;  %v568_v42 = vadd.f32 %v1785_v61, %v1722_v19  ;;  %v648_v8 = vadd.f32 %v1787_v62, %v1722_v19 }
 0x15a   : > { %v1295_v36 = vpop.eup %1294  ;;  %919 = vst [vmem:[%s1769_s4 + $0xb8] sm:$0xff] %v887_v33  ;;  %v811_v43 = vadd.f32 1.0, %v1293_v24  ;;  %v698_v2 = vmax.f32 %v644_v41, 0.0  ;;  %v574_v20 = vadd.f32 %v1796_v26, %v1722_v19  ;;  %v654_v61 = vadd.f32 %v1798_v27, %v1722_v19 }
 0x15b   : > { %v1297_v38 = vpop.eup %1296  ;;  %904 = vst [vmem:[%s1769_s4 + $0x40] sm:$0xff] %v872_v58  ;;  %v827_v45 = vadd.f32 1.0, %v1295_v36  ;;  %v683_v13 = vmax.f32 %v568_v42, 0.0  ;;  %v699_v15 = vmax.f32 %v648_v8, 0.0  ;;  %v578_v23 = vadd.f32 %v1810_v4, %v1722_v19 }
 0x15c   : > { %v1299_v47 = vpop.eup %1298  ;;  %v888_v53 = vmul.f32 %v1297_v38, %v696_v16  ;;  %1318 = vrcp.f32 %v811_v43  ;;  %v684_v31 = vmax.f32 %v574_v20, 0.0  ;;  %v700_v33 = vmax.f32 %v654_v61, 0.0 }
 0x15d   : > { %v1301_v54 = vpop.eup %1300  ;;  %v873_v55 = vmul.f32 %v1299_v47, %v681_v44  ;;  %1320 = vrcp.f32 %v827_v45  ;;  %v658_v27 = vadd.f32 %v1812_v52, %v1722_v19  ;;  %v584_v58 = vadd.f32 %v1827_v9, %v1722_v19 }
 0x15e   : > { %v1303_v37 = vpop.eup %1302  ;;  %920 = vst [vmem:[%s1769_s4 + $0xc0] sm:$0xff] %v888_v53  ;;  %v812_v39 = vadd.f32 1.0, %v1301_v54  ;;  %1322 = vpow2.f32 %v766_v29  ;;  %v685_v4 = vmax.f32 %v578_v23, 0.0  ;;  %v664_v52 = vadd.f32 %v1829_v10, %v1722_v19 }
 0x15f   : > { %v1305_v48 = vpop.eup %1304  ;;  %905 = vst [vmem:[%s1769_s4 + $0x48] sm:$0xff] %v873_v55  ;;  %v828_v57 = vadd.f32 1.0, %v1303_v37  ;;  %1324 = vpow2.f32 %v798_v46  ;;  %v701_v21 = vmax.f32 %v658_v27, 0.0  ;;  %v686_v38 = vmax.f32 %v584_v58, 0.0 }
 0x160   : > { %v1307_v60 = vpop.eup %1306  ;;  %v889_v63 = vmul.f32 %v1305_v48, %v697_v11  ;;  %1326 = vrcp.f32 %v812_v39  ;;  %v702_v45 = vmax.f32 %v664_v52, 0.0  ;;  %v588_v10 = vadd.f32 %v1842_v50, %v1722_v19 }
 0x161   : > { %v1309_v28 = vpop.eup %1308  ;;  %v874_v0 = vmul.f32 %v1307_v60, %v682_v22  ;;  %1328 = vrcp.f32 %v828_v57  ;;  %v668_v53 = vadd.f32 %v1844_v51, %v1722_v19 }
 0x162   : > { %v1311_v49 = vpop.eup %1310  ;;  %921 = vst [vmem:[%s1769_s4 + $0xc8] sm:$0xff] %v889_v63  ;;  %v813_v40 = vadd.f32 1.0, %v1309_v28  ;;  %v687_v54 = vmax.f32 %v588_v10, 0.0 }
 0x163   : > { %v1313_v1 = vpop.eup %1312  ;;  %906 = vst [vmem:[%s1769_s4 + $0x50] sm:$0xff] %v874_v0  ;;  %v829_v3 = vadd.f32 1.0, %v1311_v49  ;;  %v703_v37 = vmax.f32 %v668_v53, 0.0 }
 0x164   : > { %v1315_v6 = vpop.eup %1314  ;;  %1330 = vrcp.f32 %v813_v40  ;;  %v814_v56 = vadd.f32 1.0, %v1313_v1 }
 0x165   : > { %v890_v7 = vmul.f32 %v1315_v6, %v698_v2  ;;  %1332 = vrcp.f32 %v829_v3  ;;  %v1317_v5 = vpop.eup %1316 }
 0x166   : > { %1334 = vrcp.f32 %v814_v56  ;;  %v830_v12 = vadd.f32 1.0, %v1317_v5 }
 0x167   : > { %922 = vst [vmem:[%s1769_s4 + $0xd0] sm:$0xff] %v890_v7 }
 0x168   : > { %1336 = vrcp.f32 %v830_v12 }
 0x169   : > { %v1319_v14 = vpop.eup %1318 }
 0x16a   : > { %v1321_v17 = vpop.eup %1320  ;;  %v875_v18 = vmul.f32 %v1319_v14, %v683_v13 }
 0x16b   : > { %v1323_v62 = vpop.eup %1322  ;;  %v891_v25 = vmul.f32 %v1321_v17, %v699_v15 }
 0x16c   : > { %v1325_v30 = vpop.eup %1324  ;;  %907 = vst [vmem:[%s1769_s4 + $0x58] sm:$0xff] %v875_v18  ;;  %v815_v32 = vadd.f32 1.0, %v1323_v62 }
 0x16d   : > { %v1327_v26 = vpop.eup %1326  ;;  %923 = vst [vmem:[%s1769_s4 + $0xd8] sm:$0xff] %v891_v25  ;;  %v831_v34 = vadd.f32 1.0, %v1325_v30 }
 0x16e   : > { %v1329_v35 = vpop.eup %1328  ;;  %v876_v24 = vmul.f32 %v1327_v26, %v684_v31  ;;  %1338 = vrcp.f32 %v815_v32 }
 0x16f   : > { %v892_v36 = vmul.f32 %v1329_v35, %v700_v33  ;;  %1340 = vrcp.f32 %v831_v34 }
 0x170   : > { %908 = vst [vmem:[%s1769_s4 + $0x60] sm:$0xff] %v876_v24 }
 0x171   : > { %v1331_v16 = vpop.eup %1330  ;;  %924 = vst [vmem:[%s1769_s4 + $0xe0] sm:$0xff] %v892_v36 }
 0x172   : > { %v1333_v43 = vpop.eup %1332  ;;  %v877_v29 = vmul.f32 %v1331_v16, %v685_v4 }
 0x173   : > { %v1335_v9 = vpop.eup %1334  ;;  %v893_v44 = vmul.f32 %v1333_v43, %v701_v21 }
 0x174   : > { %909 = vst [vmem:[%s1769_s4 + $0x68] sm:$0xff] %v877_v29  ;;  %v878_v59 = vmul.f32 %v1335_v9, %v686_v38 }
 0x175   : > { %925 = vst [vmem:[%s1769_s4 + $0xe8] sm:$0xff] %v893_v44  ;;  %v1337_v46 = vpop.eup %1336 }
 0x176   : > { %910 = vst [vmem:[%s1769_s4 + $0x70] sm:$0xff] %v878_v59  ;;  %v894_v47 = vmul.f32 %v1337_v46, %v702_v45 }
 0x178   : > { %926 = vst [vmem:[%s1769_s4 + $0xf0] sm:$0xff] %v894_v47 }
 0x17b   : > { %v1339_v55 = vpop.eup %1338 }
 0x17c   : > { %v1341_v11 = vpop.eup %1340  ;;  %v879_v39 = vmul.f32 %v1339_v55, %v687_v54 }
 0x17d   : > { %v895_v19 = vmul.f32 %v1341_v11, %v703_v37 }
 0x17e   : > { %911 = vst [vmem:[%s1769_s4 + $0x78] sm:$0xff] %v879_v39 }
 0x17f   : > { %927 = vst [vmem:[%s1769_s4 + $0xf8] sm:$0xff] %v895_v19 }
 0x180   : > { %1355 = shalt.err (!%p1352_p13)
}
 0x181   : > { %s1356_s27 = scalar_lea.hbm %s1909_s11, 4096  ;;  %s1360_s5 = scalar_lea.hbm %s1977_s3, 16384 }
 0x182   : > { %p1357_p0 = scmp.ne.s32.totalorder %s1909_s11, %s1356_s27  ;;  %p1361_p3 = scmp.lt.s32.totalorder %s1909_s11, %s1977_s3 }
 0x183   : > { %p1362_p4 = scmp.lt.s32.totalorder %s1360_s5, %s1356_s27 }
 0x184   : > { %p1358_p1 = pnand %p1357_p0, %p1549_p7 }
 0x185   : > { %p1363_p5 = por %p1362_p4, %p1361_p3 }
 0x186   : > { %p1359_p2 = pneg %p1358_p1 }
 0x188   : > { %p1364_p6 = pnand %p1363_p5, %p1359_p2 }
 0x18a   : > { %1367 = shalt.err (!%p1364_p6)
}
 0x18b   : > { %s1454_s10 = smov 128   ;;  %s1455_s23 = smov 256  }
 0x18c   : > { %s1456_s28 = smov 8  }
 0x18d   : > { %1099 = dma.vmem_to_hbm [thread:$0]  (%p1549_p7), %s1911_s9, 4096, %s1909_s11, %s1917_s22, %s1454_s10, %s1455_s23, %s1456_s28  }
 0x18e PF: > { %p1105_p8 = scmp.ge.s32.totalorder %s1450_s21, 2  ;;  %s959_s26 = sand.u32 1, %s1414_s12  }
 0x18f   : > { %s960_s29 = scalar_lea.sflag [#allocation4], %s959_s26 }
 0x190   : > { %p1102_p9 = pnand %p1105_p8, %p1557_p12 }
 0x192   : > { %p1103_p10 = pneg %p1102_p9 }
 0x194   : > { %1409 = dma.done.wait (%p1103_p10), %s960_s29, 4096  }
 0x195   : > { %1411 = vsyncadd (%p1103_p10), %s960_s29, 4294963200  ;;  %s16_s21 = sadd.s32 1, %s1450_s21   ;;  %s1981_s12 = smov %s1418_s13 }
 0x196   : > { %p13_p11 = scmp.ge.s32.totalorder %s16_s21, 6   ;;  %s1982_s13 = smov %s1422_s14 }
 0x197   : > { %s1983_s14 = smov %s1565_s8  ;;  %s1984_s15 = smov %s1430_s16 }
 0x198   : > { %s1985_s16 = smov %s1562_s7  ;;  %s1986_s17 = smov %s1442_s19 }
 0x199   : > { %s1987_s18 = smov %s1446_s20  ;;  %s1988_s19 = smov %s1991_s24 }
 0x19a   : > { %s1989_s20 = smov %s1995_s25  ;;  %15 = sbr.rel (!%p13_p11) target bundleno = 6 (0x6), region = 116 }
 0x19f   :  { %965 = vsyncpa [#allocation4], 1 }
 0x1a0   :  { %967 = vsyncpa [#allocation4 + $0x1], 1 }

</bundles_post_ra>
